<compile_context>
chip_gen: v7x
topology: tpu7x:2x2x1
jax: 0.10.0
libtpu: 0.0.40
codegen_flags: <defaults>
</compile_context>

<pallas_src>
import math
from dataclasses import dataclass
from functools import partial

import jax
import jax.numpy as jnp
from jax.experimental import pallas as pl
from jax.experimental.pallas import tpu as pltpu


# ----------------------------------------------------------------------------
# Config
# ----------------------------------------------------------------------------
@dataclass
class Config:
    flow_type: str = "ot"
    latent_dim: int = 32
    hidden_dim: int = 64
    use_feature_mixing: bool = True


# ----------------------------------------------------------------------------
# Helpers
# ----------------------------------------------------------------------------
def _round_up(n, m):
    return ((n + m - 1) // m) * m


def _cdiv(a, b):
    return -(-a // b)


def _erf_approx(x):
    # Abramowitz & Stegun 7.1.26 rational approximation, |abs err| < 1.5e-7.
    # Uses only exp / basic VPU ops so it is guaranteed to lower in Mosaic.
    p = 0.3275911
    a1, a2, a3, a4, a5 = (0.254829592, -0.284496736, 1.421413741,
                          -1.453152027, 1.061405429)
    ax = jnp.abs(x)
    tt = 1.0 / (1.0 + p * ax)
    poly = ((((a5 * tt + a4) * tt + a3) * tt + a2) * tt + a1) * tt
    y = 1.0 - poly * jnp.exp(-(ax * ax))
    return jnp.where(x >= 0.0, y, -y)


def _gelu_kernel(x):
    # PyTorch nn.GELU (erf form), with erf replaced by the A&S approximation.
    return 0.5 * x * (1.0 + _erf_approx(x * (1.0 / math.sqrt(2.0))))


def _gelu_exact(x):
    # Exact erf form for the pure-JAX reference (runs outside the kernel).
    return 0.5 * x * (1.0 + jax.lax.erf(x * (1.0 / math.sqrt(2.0))))


# --- weight packing helpers (run in the XLA wrapper, NOT inside the kernel) ---
def _place_cols(w, total_cols, col_off):
    """Place (r, c) matrix at column offset `col_off` of an (r, total_cols) zero matrix."""
    r, c = w.shape
    out = jnp.zeros((r, total_cols), w.dtype)
    return out.at[:, col_off:col_off + c].set(w)


def _block_diag_pad(ws, total_rows, total_cols):
    """Block-diagonal stack, zero-padded to (total_rows, total_cols)."""
    out = jnp.zeros((total_rows, total_cols), ws[0].dtype)
    r0 = c0 = 0
    for w in ws:
        r, c = w.shape
        out = out.at[r0:r0 + r, c0:c0 + c].set(w)
        r0 += r
        c0 += c
    return out


def _concat_pad(ws, total_cols):
    cat = jnp.concatenate(ws, axis=1)
    return jnp.pad(cat, ((0, 0), (0, total_cols - cat.shape[1])))


def _const_spec(shape):
    """Whole-array block with a constant index_map (stays VMEM resident)."""
    nd = len(shape)
    return pl.BlockSpec(tuple(shape), lambda i: (0,) * nd)


# ----------------------------------------------------------------------------
# Fused Pallas kernel: feature mixer + all three OT flows for one batch tile
# ----------------------------------------------------------------------------
def _make_fused_kernel(use_mixer: bool, D: int, DP: int):
    """Input: one packed (TB, IN_W) slab = [cell | prot | pert | t | 0].
    Output: one packed (TB, 3*DP) slab = [x_t | u_t | v], each lane-padded to DP.
    All matmuls are full-block; the three velocity nets run as one block-diagonal
    2-layer MLP ((DP x HP) and (HP x DP))."""

    def kernel(*refs):
        if use_mixer:
            (inp_ref,
             mw1x, mw1y, mb1, mgam, mbet, mw2c, mw2p, x0b,
             e_x0_cell, e_x1_prot, e_x1_pert,
             w1bd, wtp, b1p, w2bd, b2p,
             out_ref) = refs
        else:
            (inp_ref,
             e_x0_cell, e_x0_pert, e_x1_prot, e_x1_pert,
             w1bd, wtp, b1p, w2bd, b2p,
             out_ref) = refs

        f32 = jnp.float32
        inp = inp_ref[...].astype(f32)              # [TB, IN_W]
        cell = inp[:, 0:D]
        prot = inp[:, D:2 * D]
        pert = inp[:, 2 * D:3 * D]
        t = inp[:, 3 * D:3 * D + 1]                 # [TB, 1]

        if use_mixer:
            # feature_mixer(concat([x, protein])) for x in {cell, pert};
            # protein @ W1y is shared between the two mixes.
            p_term = jnp.dot(prot, mw1y[...], preferred_element_type=f32)

            def mix_act(x):
                h = jnp.dot(x, mw1x[...], preferred_element_type=f32) + p_term + mb1[...]
                mu = jnp.mean(h, axis=-1, keepdims=True)
                var = jnp.mean((h - mu) ** 2, axis=-1, keepdims=True)
                hn = (h - mu) * jax.lax.rsqrt(var + 1e-5)
                return _gelu_kernel(hn * mgam[...] + mbet[...])

            a_cell = mix_act(cell)                  # [TB, D]
            a_pert = mix_act(pert)                  # [TB, D]
            # X0 = [cell | mix(cell,prot) | mix(pert,prot) | 0]  (lane-packed, DP wide)
            x0 = (jnp.dot(cell, e_x0_cell[...], preferred_element_type=f32)
                  + jnp.dot(a_cell, mw2c[...], preferred_element_type=f32)
                  + jnp.dot(a_pert, mw2p[...], preferred_element_type=f32)
                  + x0b[...])
        else:
            # X0 = [cell | cell | pert | 0]
            x0 = (jnp.dot(cell, e_x0_cell[...], preferred_element_type=f32)
                  + jnp.dot(pert, e_x0_pert[...], preferred_element_type=f32))

        # X1 = [prot | pert | prot | 0]
        x1 = (jnp.dot(prot, e_x1_prot[...], preferred_element_type=f32)
              + jnp.dot(pert, e_x1_pert[...], preferred_element_type=f32))

        xt = (1.0 - t) * x0 + t * x1                # [TB, DP]
        ut = x1 - x0                                # [TB, DP]

        # All three velocity nets as one block-diagonal 2-layer MLP.
        h = jnp.dot(xt, w1bd[...], preferred_element_type=f32) + t * wtp[...] + b1p[...]
        v = jnp.dot(_gelu_kernel(h), w2bd[...], preferred_element_type=f32) + b2p[...]

        # Single lane-dense output slab: [x_t | u_t | v] (all stores 128-aligned).
        out_ref[:, 0:DP] = xt.astype(out_ref.dtype)
        out_ref[:, DP:2 * DP] = ut.astype(out_ref.dtype)
        out_ref[:, 2 * DP:3 * DP] = v.astype(out_ref.dtype)

    return kernel


# ----------------------------------------------------------------------------
# Parameter init (deterministic, PyTorch-Linear-style uniform +-1/sqrt(fan_in))
# ----------------------------------------------------------------------------
def _linear_init(key, fan_in, fan_out):
    kw, kb = jax.random.split(key)
    bound = 1.0 / math.sqrt(fan_in)
    w = jax.random.uniform(kw, (fan_in, fan_out), jnp.float32, -bound, bound)
    b = jax.random.uniform(kb, (1, fan_out), jnp.float32, -bound, bound)
    return w, b


def init_flow_params(key, cfg):
    D, H = cfg.latent_dim, cfg.hidden_dim
    k1, k2 = jax.random.split(key)
    w1_full, b1 = _linear_init(k1, D + 1, H)     # velocity-net layer 1 on [x_t ; t]
    w2, b2 = _linear_init(k2, H, D)
    return {"w1": w1_full[:D], "wt": w1_full[D:].reshape(1, H),
            "b1": b1, "w2": w2, "b2": b2}


def init_mixer_params(key, cfg):
    D = cfg.latent_dim
    k1, k2 = jax.random.split(key)
    w1_full, b1 = _linear_init(k1, 2 * D, D)
    w2, b2 = _linear_init(k2, D, D)
    return {"w1x": w1_full[:D], "w1y": w1_full[D:], "b1": b1,
            "gamma": jnp.ones((1, D), jnp.float32),
            "beta": jnp.zeros((1, D), jnp.float32),
            "w2": w2, "b2": b2}


def init_triple_flow(key, cfg):
    ks = jax.random.split(key, 4)
    params = {
        "cell_to_pert": init_flow_params(ks[0], cfg),
        "cell_to_protein": init_flow_params(ks[1], cfg),
        "pert_to_protein": init_flow_params(ks[2], cfg),
    }
    params["feature_mixer"] = init_mixer_params(ks[3], cfg) if cfg.use_feature_mixing else None
    return params


# ----------------------------------------------------------------------------
# TripleFlow forward (single fused pallas_call)
# ----------------------------------------------------------------------------
def triple_flow_forward(params, embeddings, t, *, block_rows=1024):
    """Mirrors TripleFlow.forward (return_regularization=False path).
    Returns {flow_name: (x_t, u_t, v_pred)} with each array shaped [B, D]."""
    mixer = params["feature_mixer"]
    use_mixer = mixer is not None

    cell = embeddings["cell_emb"]
    prot = embeddings["protein_emb"]
    has_pert = "pert_emb" in embeddings
    # If no pert_emb, only the cell->protein flow is returned; feeding zeros keeps
    # one kernel variant (the unused flow slots are sliced away below).
    pert = embeddings["pert_emb"] if has_pert else jnp.zeros_like(cell)

    B, D = cell.shape
    out_dtype = cell.dtype
    f32 = jnp.float32

    t = jnp.asarray(t, f32)
    if t.ndim == 1:
        t = t[:, None]
    assert t.shape == (B, 1), f"t must have shape ({B}, 1) or ({B},), got {t.shape}"

    DP = _round_up(3 * D, 128)          # lane-packed per-stream width (x_t / u_t / v)
    HP = _round_up(3 * len(params["cell_to_protein"]["b1"][0]) * 0 + 3 * params["cell_to_protein"]["w2"].shape[0], 128)
    IN_W = _round_up(3 * D + 1, 128)    # packed input width: [cell|prot|pert|t|0]

    # ---- batch tiling ---------------------------------------------------------
    n_steps = max(1, _cdiv(B, block_rows))
    if B >= 16:
        n_steps = max(n_steps, 2)       # v7x: >=2 grid steps so both TCs get work
    tb = _round_up(_cdiv(B, n_steps), 8)
    b_pad = _round_up(B, tb)
    grid = (b_pad // tb,)

    # ---- pack the batched inputs into one lane-aligned slab -------------------
    inp = jnp.zeros((b_pad, IN_W), f32)
    inp = inp.at[:B, 0:D].set(cell.astype(f32))
    inp = inp.at[:B, D:2 * D].set(prot.astype(f32))
    inp = inp.at[:B, 2 * D:3 * D].set(pert.astype(f32))
    inp = inp.at[:B, 3 * D:3 * D + 1].set(t)

    # ---- pack / zero-pad weights on the XLA side (tiny, done once per call) ---
    eye = jnp.eye(D, dtype=f32)
    pa = params["cell_to_protein"]      # flow slot 0
    pb = params["cell_to_pert"]         # flow slot 1
    pc = params["pert_to_protein"]      # flow slot 2

    e_x1_prot = _place_cols(eye, DP, 0) + _place_cols(eye, DP, 2 * D)   # X1=[prot| . |prot]
    e_x1_pert = _place_cols(eye, DP, D)                                 #    [ . |pert| . ]
    w1bd = _block_diag_pad([pa["w1"], pb["w1"], pc["w1"]], DP, HP)      # (DP, HP)
    wtp = _concat_pad([pa["wt"], pb["wt"], pc["wt"]], HP)               # (1, HP)
    b1p = _concat_pad([pa["b1"], pb["b1"], pc["b1"]], HP)               # (1, HP)
    w2bd = _block_diag_pad([pa["w2"], pb["w2"], pc["w2"]], HP, DP)      # (HP, DP)
    b2p = _concat_pad([pa["b2"], pb["b2"], pc["b2"]], DP)               # (1, DP)

    if use_mixer:
        e_x0_cell = _place_cols(eye, DP, 0)                             # X0=[cell|gc|gp]
        mw2c = _place_cols(mixer["w2"], DP, D)
        mw2p = _place_cols(mixer["w2"], DP, 2 * D)
        x0b = _concat_pad([jnp.zeros((1, D), f32), mixer["b2"], mixer["b2"]], DP)
        weights = [mixer["w1x"], mixer["w1y"], mixer["b1"],
                   mixer["gamma"], mixer["beta"], mw2c, mw2p, x0b,
                   e_x0_cell, e_x1_prot, e_x1_pert,
                   w1bd, wtp, b1p, w2bd, b2p]
    else:
        e_x0_cell = _place_cols(eye, DP, 0) + _place_cols(eye, DP, D)   # X0=[cell|cell|pert]
        e_x0_pert = _place_cols(eye, DP, 2 * D)
        weights = [e_x0_cell, e_x0_pert, e_x1_prot, e_x1_pert,
                   w1bd, wtp, b1p, w2bd, b2p]

    # ---- VMEM budget: double-buffered in/out slabs + resident weights + slack --
    vmem_bytes = 2 * tb * (IN_W + 3 * DP) * 4 + (4 << 20)
    compiler_params = pltpu.CompilerParams(
        dimension_semantics=("parallel",),
        vmem_limit_bytes=int(min(max(vmem_bytes, 16 << 20), 48 << 20)),
    )

    out = pl.pallas_call(
        _make_fused_kernel(use_mixer, D, DP),
        out_shape=jax.ShapeDtypeStruct((b_pad, 3 * DP), out_dtype),
        grid_spec=pltpu.PrefetchScalarGridSpec(
            num_scalar_prefetch=0,
            grid=grid,
            in_specs=[pl.BlockSpec((tb, IN_W), lambda i: (i, 0))]
                     + [_const_spec(w.shape) for w in weights],
            out_specs=pl.BlockSpec((tb, 3 * DP), lambda i: (i, 0)),
        ),
        compiler_params=compiler_params,
    )(inp, *weights)

    xt_all = out[:B, 0:DP]
    ut_all = out[:B, DP:2 * DP]
    v_all = out[:B, 2 * DP:3 * DP]

    def split(f):
        s = slice(f * D, (f + 1) * D)
        return (xt_all[:, s], ut_all[:, s], v_all[:, s])

    flows = {"cell_protein": split(0)}
    if has_pert:
        flows["cell_pert"] = split(1)
        flows["pert_protein"] = split(2)
    return flows


# ----------------------------------------------------------------------------
# Pure-JAX reference (original, unpacked formulation) for validation
# ----------------------------------------------------------------------------
def _reference_forward(params, embeddings, t):
    hp = jax.lax.Precision.HIGHEST
    m = params["feature_mixer"]

    def mix(x, y):
        if m is None:
            return x
        xy = jnp.concatenate([x, y], axis=-1)
        w1 = jnp.concatenate([m["w1x"], m["w1y"]], axis=0)
        h = jnp.dot(xy, w1, precision=hp) + m["b1"]
        mu = h.mean(-1, keepdims=True)
        var = ((h - mu) ** 2).mean(-1, keepdims=True)
        hn = (h - mu) * jax.lax.rsqrt(var + 1e-5) * m["gamma"] + m["beta"]
        return jnp.dot(_gelu_exact(hn), m["w2"], precision=hp) + m["b2"]

    def flow(x0, x1, p):
        xt = (1.0 - t) * x0 + t * x1
        ut = x1 - x0
        h = jnp.dot(xt, p["w1"], precision=hp) + t * p["wt"] + p["b1"]
        v = jnp.dot(_gelu_exact(h), p["w2"], precision=hp) + p["b2"]
        return xt, ut, v

    cell = embeddings["cell_emb"]
    prot = embeddings["protein_emb"]
    out = {"cell_protein": flow(cell, prot, params["cell_to_protein"])}
    if "pert_emb" in embeddings:
        pert = embeddings["pert_emb"]
        gc = mix(cell, prot)
        gp = mix(pert, prot)
        out["cell_pert"] = flow(gc, pert, params["cell_to_pert"])
        out["pert_protein"] = flow(gp, prot, params["pert_to_protein"])
    return out


# ----------------------------------------------------------------------------
# Main
# ----------------------------------------------------------------------------
if __name__ == "__main__":
    cfg = Config(flow_type="ot", latent_dim=32, hidden_dim=64,
                 use_feature_mixing=True)
    B = 8

    key = jax.random.PRNGKey(0)
    k_param, k_cell, k_prot, k_pert, k_t = jax.random.split(key, 5)

    params = init_triple_flow(k_param, cfg)
    embeddings = {
        "cell_emb": jax.random.normal(k_cell, (B, cfg.latent_dim), jnp.float32),
        "protein_emb": jax.random.normal(k_prot, (B, cfg.latent_dim), jnp.float32),
        "pert_emb": jax.random.normal(k_pert, (B, cfg.latent_dim), jnp.float32),
    }
    t = jax.random.uniform(k_t, (B, 1), jnp.float32)  # flow-matching time

    fwd = jax.jit(partial(triple_flow_forward, block_rows=1024))
    flows = jax.block_until_ready(fwd(params, embeddings, t))

    # sanity checks against the plain-JAX reference (all three flows)
    ref = _reference_forward(params, embeddings, t)
    for name in ("cell_protein", "cell_pert", "pert_protein"):
        for got, want in zip(flows[name], ref[name]):
            assert got.shape == (B, cfg.latent_dim)
            assert bool(jnp.all(jnp.isfinite(got)))
            assert bool(jnp.allclose(got, want, rtol=2e-2, atol=2e-2)), (
                name, float(jnp.max(jnp.abs(got - want))))

    # also exercise the pert-less path (only cell_protein is produced)
    emb2 = {"cell_emb": embeddings["cell_emb"], "protein_emb": embeddings["protein_emb"]}
    flows2 = jax.block_until_ready(jax.jit(triple_flow_forward)(params, emb2, t))
    ref2 = _reference_forward(params, emb2, t)
    assert set(flows2.keys()) == {"cell_protein"}
    for got, want in zip(flows2["cell_protein"], ref2["cell_protein"]):
        assert bool(jnp.allclose(got, want, rtol=2e-2, atol=2e-2))

    print("KERNEL_OK")
</pallas_src>

<mosaic_0001>
module attributes {stable_mosaic.version = 11 : i64} {
  func.func @kernel(%arg0: i32, %arg1: memref<8x128xf32, #tpu.memory_space<vmem>>, %arg2: memref<32x32xf32, #tpu.memory_space<vmem>>, %arg3: memref<32x32xf32, #tpu.memory_space<vmem>>, %arg4: memref<1x32xf32, #tpu.memory_space<vmem>>, %arg5: memref<1x32xf32, #tpu.memory_space<vmem>>, %arg6: memref<1x32xf32, #tpu.memory_space<vmem>>, %arg7: memref<32x128xf32, #tpu.memory_space<vmem>>, %arg8: memref<32x128xf32, #tpu.memory_space<vmem>>, %arg9: memref<1x128xf32, #tpu.memory_space<vmem>>, %arg10: memref<32x128xf32, #tpu.memory_space<vmem>>, %arg11: memref<32x128xf32, #tpu.memory_space<vmem>>, %arg12: memref<32x128xf32, #tpu.memory_space<vmem>>, %arg13: memref<128x256xf32, #tpu.memory_space<vmem>>, %arg14: memref<1x256xf32, #tpu.memory_space<vmem>>, %arg15: memref<1x256xf32, #tpu.memory_space<vmem>>, %arg16: memref<256x128xf32, #tpu.memory_space<vmem>>, %arg17: memref<1x128xf32, #tpu.memory_space<vmem>>, %arg18: memref<8x384xf32, #tpu.memory_space<vmem>>) attributes {dimension_semantics = [#tpu.dimension_semantics<parallel>], iteration_bounds = array<i64: 1>, scalar_prefetch = 0 : i64, scratch_operands = 0 : i64, tpu.core_type = #tpu.core_type<tc>, window_params = [{transform_indices = @transform_0, window_bounds = array<i64: 8, 128>}, {pipeline_mode = #tpu.pipeline_mode<synchronous>, transform_indices = @transform_1, window_bounds = array<i64: 32, 32>}, {pipeline_mode = #tpu.pipeline_mode<synchronous>, transform_indices = @transform_2, window_bounds = array<i64: 32, 32>}, {pipeline_mode = #tpu.pipeline_mode<synchronous>, transform_indices = @transform_3, window_bounds = array<i64: 1, 32>}, {pipeline_mode = #tpu.pipeline_mode<synchronous>, transform_indices = @transform_4, window_bounds = array<i64: 1, 32>}, {pipeline_mode = #tpu.pipeline_mode<synchronous>, transform_indices = @transform_5, window_bounds = array<i64: 1, 32>}, {pipeline_mode = #tpu.pipeline_mode<synchronous>, transform_indices = @transform_6, window_bounds = array<i64: 32, 128>}, {pipeline_mode = #tpu.pipeline_mode<synchronous>, transform_indices = @transform_7, window_bounds = array<i64: 32, 128>}, {pipeline_mode = #tpu.pipeline_mode<synchronous>, transform_indices = @transform_8, window_bounds = array<i64: 1, 128>}, {pipeline_mode = #tpu.pipeline_mode<synchronous>, transform_indices = @transform_9, window_bounds = array<i64: 32, 128>}, {pipeline_mode = #tpu.pipeline_mode<synchronous>, transform_indices = @transform_10, window_bounds = array<i64: 32, 128>}, {pipeline_mode = #tpu.pipeline_mode<synchronous>, transform_indices = @transform_11, window_bounds = array<i64: 32, 128>}, {pipeline_mode = #tpu.pipeline_mode<synchronous>, transform_indices = @transform_12, window_bounds = array<i64: 128, 256>}, {pipeline_mode = #tpu.pipeline_mode<synchronous>, transform_indices = @transform_13, window_bounds = array<i64: 1, 256>}, {pipeline_mode = #tpu.pipeline_mode<synchronous>, transform_indices = @transform_14, window_bounds = array<i64: 1, 256>}, {pipeline_mode = #tpu.pipeline_mode<synchronous>, transform_indices = @transform_15, window_bounds = array<i64: 256, 128>}, {pipeline_mode = #tpu.pipeline_mode<synchronous>, transform_indices = @transform_16, window_bounds = array<i64: 1, 128>}, {transform_indices = @transform_17, window_bounds = array<i64: 8, 384>}]} {
    %c0 = arith.constant 0 : index
    %c0_0 = arith.constant 0 : index
    %0 = vector.load %arg1[%c0, %c0_0] : memref<8x128xf32, #tpu.memory_space<vmem>>, vector<8x128xf32>
    %1 = vector.extract_strided_slice %0 {offsets = [0, 0], sizes = [8, 32], strides = [1, 1]} : vector<8x128xf32> to vector<8x32xf32>
    %2 = vector.extract_strided_slice %0 {offsets = [0, 32], sizes = [8, 32], strides = [1, 1]} : vector<8x128xf32> to vector<8x32xf32>
    %3 = vector.extract_strided_slice %0 {offsets = [0, 64], sizes = [8, 32], strides = [1, 1]} : vector<8x128xf32> to vector<8x32xf32>
    %4 = vector.extract_strided_slice %0 {offsets = [0, 96], sizes = [8, 1], strides = [1, 1]} : vector<8x128xf32> to vector<8x1xf32>
    %c0_1 = arith.constant 0 : index
    %c0_2 = arith.constant 0 : index
    %5 = vector.load %arg3[%c0_1, %c0_2] : memref<32x32xf32, #tpu.memory_space<vmem>>, vector<32x32xf32>
    %cst = arith.constant dense<0.000000e+00> : vector<8x32xf32>
    %6 = tpu.matmul %2, %5, %cst {dimension_numbers = #tpu.dot_dimension_numbers<[1], [0], [0], [1], [0, 0, 1, 1], [], []>} : vector<8x32xf32>, vector<32x32xf32>, vector<8x32xf32> -> vector<8x32xf32>
    %c0_3 = arith.constant 0 : index
    %c0_4 = arith.constant 0 : index
    %7 = vector.load %arg2[%c0_3, %c0_4] : memref<32x32xf32, #tpu.memory_space<vmem>>, vector<32x32xf32>
    %cst_5 = arith.constant dense<0.000000e+00> : vector<8x32xf32>
    %8 = tpu.matmul %1, %7, %cst_5 {dimension_numbers = #tpu.dot_dimension_numbers<[1], [0], [0], [1], [0, 0, 1, 1], [], []>} : vector<8x32xf32>, vector<32x32xf32>, vector<8x32xf32> -> vector<8x32xf32>
    %9 = arith.addf %8, %6 : vector<8x32xf32>
    %c0_6 = arith.constant 0 : index
    %c0_7 = arith.constant 0 : index
    %10 = vector.load %arg4[%c0_6, %c0_7] : memref<1x32xf32, #tpu.memory_space<vmem>>, vector<1x32xf32>
    %11 = vector.broadcast %10 : vector<1x32xf32> to vector<8x32xf32>
    %12 = arith.addf %9, %11 : vector<8x32xf32>
    %cst_8 = arith.constant dense<0.000000e+00> : vector<8xf32>
    %13 = vector.multi_reduction <add>, %12, %cst_8 [1] : vector<8x32xf32> to vector<8xf32>
    %14 = vector.shape_cast %13 : vector<8xf32> to vector<8x1xf32>
    %cst_9 = arith.constant 3.200000e+01 : f32
    %15 = vector.broadcast %cst_9 : f32 to vector<8x1xf32>
    %16 = arith.divf %14, %15 : vector<8x1xf32>
    %17 = vector.broadcast %16 : vector<8x1xf32> to vector<8x32xf32>
    %18 = arith.subf %12, %17 : vector<8x32xf32>
    %19 = arith.mulf %18, %18 : vector<8x32xf32>
    %cst_10 = arith.constant dense<0.000000e+00> : vector<8xf32>
    %20 = vector.multi_reduction <add>, %19, %cst_10 [1] : vector<8x32xf32> to vector<8xf32>
    %21 = vector.shape_cast %20 : vector<8xf32> to vector<8x1xf32>
    %cst_11 = arith.constant 3.200000e+01 : f32
    %22 = vector.broadcast %cst_11 : f32 to vector<8x1xf32>
    %23 = arith.divf %21, %22 : vector<8x1xf32>
    %24 = vector.broadcast %16 : vector<8x1xf32> to vector<8x32xf32>
    %25 = arith.subf %12, %24 : vector<8x32xf32>
    %cst_12 = arith.constant 9.99999974E-6 : f32
    %26 = vector.broadcast %cst_12 : f32 to vector<8x1xf32>
    %27 = arith.addf %23, %26 : vector<8x1xf32>
    %28 = math.rsqrt %27 : vector<8x1xf32>
    %29 = vector.broadcast %28 : vector<8x1xf32> to vector<8x32xf32>
    %30 = arith.mulf %25, %29 : vector<8x32xf32>
    %c0_13 = arith.constant 0 : index
    %c0_14 = arith.constant 0 : index
    %31 = vector.load %arg5[%c0_13, %c0_14] : memref<1x32xf32, #tpu.memory_space<vmem>>, vector<1x32xf32>
    %32 = vector.broadcast %31 : vector<1x32xf32> to vector<8x32xf32>
    %33 = arith.mulf %30, %32 : vector<8x32xf32>
    %c0_15 = arith.constant 0 : index
    %c0_16 = arith.constant 0 : index
    %34 = vector.load %arg6[%c0_15, %c0_16] : memref<1x32xf32, #tpu.memory_space<vmem>>, vector<1x32xf32>
    %35 = vector.broadcast %34 : vector<1x32xf32> to vector<8x32xf32>
    %36 = arith.addf %33, %35 : vector<8x32xf32>
    %cst_17 = arith.constant 5.000000e-01 : f32
    %37 = vector.broadcast %cst_17 : f32 to vector<8x32xf32>
    %38 = arith.mulf %37, %36 : vector<8x32xf32>
    %cst_18 = arith.constant 0.707106769 : f32
    %39 = vector.broadcast %cst_18 : f32 to vector<8x32xf32>
    %40 = arith.mulf %36, %39 : vector<8x32xf32>
    %41 = math.absf %40 : vector<8x32xf32>
    %cst_19 = arith.constant 0.327591091 : f32
    %42 = vector.broadcast %cst_19 : f32 to vector<8x32xf32>
    %43 = arith.mulf %42, %41 : vector<8x32xf32>
    %cst_20 = arith.constant 1.000000e+00 : f32
    %44 = vector.broadcast %cst_20 : f32 to vector<8x32xf32>
    %45 = arith.addf %44, %43 : vector<8x32xf32>
    %cst_21 = arith.constant 1.000000e+00 : f32
    %46 = vector.broadcast %cst_21 : f32 to vector<8x32xf32>
    %47 = arith.divf %46, %45 : vector<8x32xf32>
    %cst_22 = arith.constant 1.06140542 : f32
    %48 = vector.broadcast %cst_22 : f32 to vector<8x32xf32>
    %49 = arith.mulf %48, %47 : vector<8x32xf32>
    %cst_23 = arith.constant -1.45315206 : f32
    %50 = vector.broadcast %cst_23 : f32 to vector<8x32xf32>
    %51 = arith.addf %49, %50 : vector<8x32xf32>
    %52 = arith.mulf %51, %47 : vector<8x32xf32>
    %cst_24 = arith.constant 1.42141378 : f32
    %53 = vector.broadcast %cst_24 : f32 to vector<8x32xf32>
    %54 = arith.addf %52, %53 : vector<8x32xf32>
    %55 = arith.mulf %54, %47 : vector<8x32xf32>
    %cst_25 = arith.constant -0.284496725 : f32
    %56 = vector.broadcast %cst_25 : f32 to vector<8x32xf32>
    %57 = arith.addf %55, %56 : vector<8x32xf32>
    %58 = arith.mulf %57, %47 : vector<8x32xf32>
    %cst_26 = arith.constant 0.254829586 : f32
    %59 = vector.broadcast %cst_26 : f32 to vector<8x32xf32>
    %60 = arith.addf %58, %59 : vector<8x32xf32>
    %61 = arith.mulf %60, %47 : vector<8x32xf32>
    %62 = arith.mulf %41, %41 : vector<8x32xf32>
    %cst_27 = arith.constant 0.000000e+00 : f32
    %63 = vector.broadcast %cst_27 : f32 to vector<8x32xf32>
    %64 = arith.subf %63, %62 : vector<8x32xf32>
    %65 = math.exp %64 : vector<8x32xf32>
    %66 = arith.mulf %61, %65 : vector<8x32xf32>
    %cst_28 = arith.constant 1.000000e+00 : f32
    %67 = vector.broadcast %cst_28 : f32 to vector<8x32xf32>
    %68 = arith.subf %67, %66 : vector<8x32xf32>
    %cst_29 = arith.constant 0.000000e+00 : f32
    %69 = vector.broadcast %cst_29 : f32 to vector<8x32xf32>
    %70 = arith.cmpf oge, %40, %69 : vector<8x32xf32>
    %cst_30 = arith.constant 0.000000e+00 : f32
    %71 = vector.broadcast %cst_30 : f32 to vector<8x32xf32>
    %72 = arith.subf %71, %68 : vector<8x32xf32>
    %73 = arith.select %70, %68, %72 : vector<8x32xi1>, vector<8x32xf32>
    %cst_31 = arith.constant 1.000000e+00 : f32
    %74 = vector.broadcast %cst_31 : f32 to vector<8x32xf32>
    %75 = arith.addf %74, %73 : vector<8x32xf32>
    %76 = arith.mulf %38, %75 : vector<8x32xf32>
    %c0_32 = arith.constant 0 : index
    %c0_33 = arith.constant 0 : index
    %77 = vector.load %arg2[%c0_32, %c0_33] : memref<32x32xf32, #tpu.memory_space<vmem>>, vector<32x32xf32>
    %cst_34 = arith.constant dense<0.000000e+00> : vector<8x32xf32>
    %78 = tpu.matmul %3, %77, %cst_34 {dimension_numbers = #tpu.dot_dimension_numbers<[1], [0], [0], [1], [0, 0, 1, 1], [], []>} : vector<8x32xf32>, vector<32x32xf32>, vector<8x32xf32> -> vector<8x32xf32>
    %79 = arith.addf %78, %6 : vector<8x32xf32>
    %c0_35 = arith.constant 0 : index
    %c0_36 = arith.constant 0 : index
    %80 = vector.load %arg4[%c0_35, %c0_36] : memref<1x32xf32, #tpu.memory_space<vmem>>, vector<1x32xf32>
    %81 = vector.broadcast %80 : vector<1x32xf32> to vector<8x32xf32>
    %82 = arith.addf %79, %81 : vector<8x32xf32>
    %cst_37 = arith.constant dense<0.000000e+00> : vector<8xf32>
    %83 = vector.multi_reduction <add>, %82, %cst_37 [1] : vector<8x32xf32> to vector<8xf32>
    %84 = vector.shape_cast %83 : vector<8xf32> to vector<8x1xf32>
    %cst_38 = arith.constant 3.200000e+01 : f32
    %85 = vector.broadcast %cst_38 : f32 to vector<8x1xf32>
    %86 = arith.divf %84, %85 : vector<8x1xf32>
    %87 = vector.broadcast %86 : vector<8x1xf32> to vector<8x32xf32>
    %88 = arith.subf %82, %87 : vector<8x32xf32>
    %89 = arith.mulf %88, %88 : vector<8x32xf32>
    %cst_39 = arith.constant dense<0.000000e+00> : vector<8xf32>
    %90 = vector.multi_reduction <add>, %89, %cst_39 [1] : vector<8x32xf32> to vector<8xf32>
    %91 = vector.shape_cast %90 : vector<8xf32> to vector<8x1xf32>
    %cst_40 = arith.constant 3.200000e+01 : f32
    %92 = vector.broadcast %cst_40 : f32 to vector<8x1xf32>
    %93 = arith.divf %91, %92 : vector<8x1xf32>
    %94 = vector.broadcast %86 : vector<8x1xf32> to vector<8x32xf32>
    %95 = arith.subf %82, %94 : vector<8x32xf32>
    %cst_41 = arith.constant 9.99999974E-6 : f32
    %96 = vector.broadcast %cst_41 : f32 to vector<8x1xf32>
    %97 = arith.addf %93, %96 : vector<8x1xf32>
    %98 = math.rsqrt %97 : vector<8x1xf32>
    %99 = vector.broadcast %98 : vector<8x1xf32> to vector<8x32xf32>
    %100 = arith.mulf %95, %99 : vector<8x32xf32>
    %c0_42 = arith.constant 0 : index
    %c0_43 = arith.constant 0 : index
    %101 = vector.load %arg5[%c0_42, %c0_43] : memref<1x32xf32, #tpu.memory_space<vmem>>, vector<1x32xf32>
    %102 = vector.broadcast %101 : vector<1x32xf32> to vector<8x32xf32>
    %103 = arith.mulf %100, %102 : vector<8x32xf32>
    %c0_44 = arith.constant 0 : index
    %c0_45 = arith.constant 0 : index
    %104 = vector.load %arg6[%c0_44, %c0_45] : memref<1x32xf32, #tpu.memory_space<vmem>>, vector<1x32xf32>
    %105 = vector.broadcast %104 : vector<1x32xf32> to vector<8x32xf32>
    %106 = arith.addf %103, %105 : vector<8x32xf32>
    %cst_46 = arith.constant 5.000000e-01 : f32
    %107 = vector.broadcast %cst_46 : f32 to vector<8x32xf32>
    %108 = arith.mulf %107, %106 : vector<8x32xf32>
    %cst_47 = arith.constant 0.707106769 : f32
    %109 = vector.broadcast %cst_47 : f32 to vector<8x32xf32>
    %110 = arith.mulf %106, %109 : vector<8x32xf32>
    %111 = math.absf %110 : vector<8x32xf32>
    %cst_48 = arith.constant 0.327591091 : f32
    %112 = vector.broadcast %cst_48 : f32 to vector<8x32xf32>
    %113 = arith.mulf %112, %111 : vector<8x32xf32>
    %cst_49 = arith.constant 1.000000e+00 : f32
    %114 = vector.broadcast %cst_49 : f32 to vector<8x32xf32>
    %115 = arith.addf %114, %113 : vector<8x32xf32>
    %cst_50 = arith.constant 1.000000e+00 : f32
    %116 = vector.broadcast %cst_50 : f32 to vector<8x32xf32>
    %117 = arith.divf %116, %115 : vector<8x32xf32>
    %cst_51 = arith.constant 1.06140542 : f32
    %118 = vector.broadcast %cst_51 : f32 to vector<8x32xf32>
    %119 = arith.mulf %118, %117 : vector<8x32xf32>
    %cst_52 = arith.constant -1.45315206 : f32
    %120 = vector.broadcast %cst_52 : f32 to vector<8x32xf32>
    %121 = arith.addf %119, %120 : vector<8x32xf32>
    %122 = arith.mulf %121, %117 : vector<8x32xf32>
    %cst_53 = arith.constant 1.42141378 : f32
    %123 = vector.broadcast %cst_53 : f32 to vector<8x32xf32>
    %124 = arith.addf %122, %123 : vector<8x32xf32>
    %125 = arith.mulf %124, %117 : vector<8x32xf32>
    %cst_54 = arith.constant -0.284496725 : f32
    %126 = vector.broadcast %cst_54 : f32 to vector<8x32xf32>
    %127 = arith.addf %125, %126 : vector<8x32xf32>
    %128 = arith.mulf %127, %117 : vector<8x32xf32>
    %cst_55 = arith.constant 0.254829586 : f32
    %129 = vector.broadcast %cst_55 : f32 to vector<8x32xf32>
    %130 = arith.addf %128, %129 : vector<8x32xf32>
    %131 = arith.mulf %130, %117 : vector<8x32xf32>
    %132 = arith.mulf %111, %111 : vector<8x32xf32>
    %cst_56 = arith.constant 0.000000e+00 : f32
    %133 = vector.broadcast %cst_56 : f32 to vector<8x32xf32>
    %134 = arith.subf %133, %132 : vector<8x32xf32>
    %135 = math.exp %134 : vector<8x32xf32>
    %136 = arith.mulf %131, %135 : vector<8x32xf32>
    %cst_57 = arith.constant 1.000000e+00 : f32
    %137 = vector.broadcast %cst_57 : f32 to vector<8x32xf32>
    %138 = arith.subf %137, %136 : vector<8x32xf32>
    %cst_58 = arith.constant 0.000000e+00 : f32
    %139 = vector.broadcast %cst_58 : f32 to vector<8x32xf32>
    %140 = arith.cmpf oge, %110, %139 : vector<8x32xf32>
    %cst_59 = arith.constant 0.000000e+00 : f32
    %141 = vector.broadcast %cst_59 : f32 to vector<8x32xf32>
    %142 = arith.subf %141, %138 : vector<8x32xf32>
    %143 = arith.select %140, %138, %142 : vector<8x32xi1>, vector<8x32xf32>
    %cst_60 = arith.constant 1.000000e+00 : f32
    %144 = vector.broadcast %cst_60 : f32 to vector<8x32xf32>
    %145 = arith.addf %144, %143 : vector<8x32xf32>
    %146 = arith.mulf %108, %145 : vector<8x32xf32>
    %c0_61 = arith.constant 0 : index
    %c0_62 = arith.constant 0 : index
    %147 = vector.load %arg10[%c0_61, %c0_62] : memref<32x128xf32, #tpu.memory_space<vmem>>, vector<32x128xf32>
    %cst_63 = arith.constant dense<0.000000e+00> : vector<8x128xf32>
    %148 = tpu.matmul %1, %147, %cst_63 {dimension_numbers = #tpu.dot_dimension_numbers<[1], [0], [0], [1], [0, 0, 1, 1], [], []>} : vector<8x32xf32>, vector<32x128xf32>, vector<8x128xf32> -> vector<8x128xf32>
    %c0_64 = arith.constant 0 : index
    %c0_65 = arith.constant 0 : index
    %149 = vector.load %arg7[%c0_64, %c0_65] : memref<32x128xf32, #tpu.memory_space<vmem>>, vector<32x128xf32>
    %cst_66 = arith.constant dense<0.000000e+00> : vector<8x128xf32>
    %150 = tpu.matmul %76, %149, %cst_66 {dimension_numbers = #tpu.dot_dimension_numbers<[1], [0], [0], [1], [0, 0, 1, 1], [], []>} : vector<8x32xf32>, vector<32x128xf32>, vector<8x128xf32> -> vector<8x128xf32>
    %151 = arith.addf %148, %150 : vector<8x128xf32>
    %c0_67 = arith.constant 0 : index
    %c0_68 = arith.constant 0 : index
    %152 = vector.load %arg8[%c0_67, %c0_68] : memref<32x128xf32, #tpu.memory_space<vmem>>, vector<32x128xf32>
    %cst_69 = arith.constant dense<0.000000e+00> : vector<8x128xf32>
    %153 = tpu.matmul %146, %152, %cst_69 {dimension_numbers = #tpu.dot_dimension_numbers<[1], [0], [0], [1], [0, 0, 1, 1], [], []>} : vector<8x32xf32>, vector<32x128xf32>, vector<8x128xf32> -> vector<8x128xf32>
    %154 = arith.addf %151, %153 : vector<8x128xf32>
    %c0_70 = arith.constant 0 : index
    %c0_71 = arith.constant 0 : index
    %155 = vector.load %arg9[%c0_70, %c0_71] : memref<1x128xf32, #tpu.memory_space<vmem>>, vector<1x128xf32>
    %156 = vector.broadcast %155 : vector<1x128xf32> to vector<8x128xf32>
    %157 = arith.addf %154, %156 : vector<8x128xf32>
    %c0_72 = arith.constant 0 : index
    %c0_73 = arith.constant 0 : index
    %158 = vector.load %arg11[%c0_72, %c0_73] : memref<32x128xf32, #tpu.memory_space<vmem>>, vector<32x128xf32>
    %cst_74 = arith.constant dense<0.000000e+00> : vector<8x128xf32>
    %159 = tpu.matmul %2, %158, %cst_74 {dimension_numbers = #tpu.dot_dimension_numbers<[1], [0], [0], [1], [0, 0, 1, 1], [], []>} : vector<8x32xf32>, vector<32x128xf32>, vector<8x128xf32> -> vector<8x128xf32>
    %c0_75 = arith.constant 0 : index
    %c0_76 = arith.constant 0 : index
    %160 = vector.load %arg12[%c0_75, %c0_76] : memref<32x128xf32, #tpu.memory_space<vmem>>, vector<32x128xf32>
    %cst_77 = arith.constant dense<0.000000e+00> : vector<8x128xf32>
    %161 = tpu.matmul %3, %160, %cst_77 {dimension_numbers = #tpu.dot_dimension_numbers<[1], [0], [0], [1], [0, 0, 1, 1], [], []>} : vector<8x32xf32>, vector<32x128xf32>, vector<8x128xf32> -> vector<8x128xf32>
    %162 = arith.addf %159, %161 : vector<8x128xf32>
    %cst_78 = arith.constant 1.000000e+00 : f32
    %163 = vector.broadcast %cst_78 : f32 to vector<8x1xf32>
    %164 = arith.subf %163, %4 : vector<8x1xf32>
    %165 = vector.broadcast %164 : vector<8x1xf32> to vector<8x128xf32>
    %166 = arith.mulf %165, %157 : vector<8x128xf32>
    %167 = vector.broadcast %4 : vector<8x1xf32> to vector<8x128xf32>
    %168 = arith.mulf %167, %162 : vector<8x128xf32>
    %169 = arith.addf %166, %168 : vector<8x128xf32>
    %170 = arith.subf %162, %157 : vector<8x128xf32>
    %c0_79 = arith.constant 0 : index
    %c0_80 = arith.constant 0 : index
    %171 = vector.load %arg13[%c0_79, %c0_80] : memref<128x256xf32, #tpu.memory_space<vmem>>, vector<128x256xf32>
    %cst_81 = arith.constant dense<0.000000e+00> : vector<8x256xf32>
    %172 = tpu.matmul %169, %171, %cst_81 {dimension_numbers = #tpu.dot_dimension_numbers<[1], [0], [0], [1], [0, 0, 1, 1], [], []>} : vector<8x128xf32>, vector<128x256xf32>, vector<8x256xf32> -> vector<8x256xf32>
    %c0_82 = arith.constant 0 : index
    %c0_83 = arith.constant 0 : index
    %173 = vector.load %arg14[%c0_82, %c0_83] : memref<1x256xf32, #tpu.memory_space<vmem>>, vector<1x256xf32>
    %174 = vector.broadcast %4 : vector<8x1xf32> to vector<8x256xf32>
    %175 = vector.broadcast %173 : vector<1x256xf32> to vector<8x256xf32>
    %176 = arith.mulf %174, %175 : vector<8x256xf32>
    %177 = arith.addf %172, %176 : vector<8x256xf32>
    %c0_84 = arith.constant 0 : index
    %c0_85 = arith.constant 0 : index
    %178 = vector.load %arg15[%c0_84, %c0_85] : memref<1x256xf32, #tpu.memory_space<vmem>>, vector<1x256xf32>
    %179 = vector.broadcast %178 : vector<1x256xf32> to vector<8x256xf32>
    %180 = arith.addf %177, %179 : vector<8x256xf32>
    %cst_86 = arith.constant 5.000000e-01 : f32
    %181 = vector.broadcast %cst_86 : f32 to vector<8x256xf32>
    %182 = arith.mulf %181, %180 : vector<8x256xf32>
    %cst_87 = arith.constant 0.707106769 : f32
    %183 = vector.broadcast %cst_87 : f32 to vector<8x256xf32>
    %184 = arith.mulf %180, %183 : vector<8x256xf32>
    %185 = math.absf %184 : vector<8x256xf32>
    %cst_88 = arith.constant 0.327591091 : f32
    %186 = vector.broadcast %cst_88 : f32 to vector<8x256xf32>
    %187 = arith.mulf %186, %185 : vector<8x256xf32>
    %cst_89 = arith.constant 1.000000e+00 : f32
    %188 = vector.broadcast %cst_89 : f32 to vector<8x256xf32>
    %189 = arith.addf %188, %187 : vector<8x256xf32>
    %cst_90 = arith.constant 1.000000e+00 : f32
    %190 = vector.broadcast %cst_90 : f32 to vector<8x256xf32>
    %191 = arith.divf %190, %189 : vector<8x256xf32>
    %cst_91 = arith.constant 1.06140542 : f32
    %192 = vector.broadcast %cst_91 : f32 to vector<8x256xf32>
    %193 = arith.mulf %192, %191 : vector<8x256xf32>
    %cst_92 = arith.constant -1.45315206 : f32
    %194 = vector.broadcast %cst_92 : f32 to vector<8x256xf32>
    %195 = arith.addf %193, %194 : vector<8x256xf32>
    %196 = arith.mulf %195, %191 : vector<8x256xf32>
    %cst_93 = arith.constant 1.42141378 : f32
    %197 = vector.broadcast %cst_93 : f32 to vector<8x256xf32>
    %198 = arith.addf %196, %197 : vector<8x256xf32>
    %199 = arith.mulf %198, %191 : vector<8x256xf32>
    %cst_94 = arith.constant -0.284496725 : f32
    %200 = vector.broadcast %cst_94 : f32 to vector<8x256xf32>
    %201 = arith.addf %199, %200 : vector<8x256xf32>
    %202 = arith.mulf %201, %191 : vector<8x256xf32>
    %cst_95 = arith.constant 0.254829586 : f32
    %203 = vector.broadcast %cst_95 : f32 to vector<8x256xf32>
    %204 = arith.addf %202, %203 : vector<8x256xf32>
    %205 = arith.mulf %204, %191 : vector<8x256xf32>
    %206 = arith.mulf %185, %185 : vector<8x256xf32>
    %cst_96 = arith.constant 0.000000e+00 : f32
    %207 = vector.broadcast %cst_96 : f32 to vector<8x256xf32>
    %208 = arith.subf %207, %206 : vector<8x256xf32>
    %209 = math.exp %208 : vector<8x256xf32>
    %210 = arith.mulf %205, %209 : vector<8x256xf32>
    %cst_97 = arith.constant 1.000000e+00 : f32
    %211 = vector.broadcast %cst_97 : f32 to vector<8x256xf32>
    %212 = arith.subf %211, %210 : vector<8x256xf32>
    %cst_98 = arith.constant 0.000000e+00 : f32
    %213 = vector.broadcast %cst_98 : f32 to vector<8x256xf32>
    %214 = arith.cmpf oge, %184, %213 : vector<8x256xf32>
    %cst_99 = arith.constant 0.000000e+00 : f32
    %215 = vector.broadcast %cst_99 : f32 to vector<8x256xf32>
    %216 = arith.subf %215, %212 : vector<8x256xf32>
    %217 = arith.select %214, %212, %216 : vector<8x256xi1>, vector<8x256xf32>
    %cst_100 = arith.constant 1.000000e+00 : f32
    %218 = vector.broadcast %cst_100 : f32 to vector<8x256xf32>
    %219 = arith.addf %218, %217 : vector<8x256xf32>
    %220 = arith.mulf %182, %219 : vector<8x256xf32>
    %c0_101 = arith.constant 0 : index
    %c0_102 = arith.constant 0 : index
    %221 = vector.load %arg16[%c0_101, %c0_102] : memref<256x128xf32, #tpu.memory_space<vmem>>, vector<256x128xf32>
    %cst_103 = arith.constant dense<0.000000e+00> : vector<8x128xf32>
    %222 = tpu.matmul %220, %221, %cst_103 {dimension_numbers = #tpu.dot_dimension_numbers<[1], [0], [0], [1], [0, 0, 1, 1], [], []>} : vector<8x256xf32>, vector<256x128xf32>, vector<8x128xf32> -> vector<8x128xf32>
    %c0_104 = arith.constant 0 : index
    %c0_105 = arith.constant 0 : index
    %223 = vector.load %arg17[%c0_104, %c0_105] : memref<1x128xf32, #tpu.memory_space<vmem>>, vector<1x128xf32>
    %224 = vector.broadcast %223 : vector<1x128xf32> to vector<8x128xf32>
    %225 = arith.addf %222, %224 : vector<8x128xf32>
    %c0_106 = arith.constant 0 : index
    %c0_107 = arith.constant 0 : index
    %226 = vector.load %arg18[%c0_106, %c0_107] : memref<8x384xf32, #tpu.memory_space<vmem>>, vector<8x128xf32>
    tpu.vector_store %arg18[%c0_106, %c0_107], %169 {strides = array<i32>} : memref<8x384xf32, #tpu.memory_space<vmem>>, vector<8x128xf32>,
    %c0_108 = arith.constant 0 : index
    %c128 = arith.constant 128 : index
    %227 = vector.load %arg18[%c0_108, %c128] : memref<8x384xf32, #tpu.memory_space<vmem>>, vector<8x128xf32>
    tpu.vector_store %arg18[%c0_108, %c128], %170 {strides = array<i32>} : memref<8x384xf32, #tpu.memory_space<vmem>>, vector<8x128xf32>,
    %c0_109 = arith.constant 0 : index
    %c256 = arith.constant 256 : index
    %228 = vector.load %arg18[%c0_109, %c256] : memref<8x384xf32, #tpu.memory_space<vmem>>, vector<8x128xf32>
    tpu.vector_store %arg18[%c0_109, %c256], %225 {strides = array<i32>} : memref<8x384xf32, #tpu.memory_space<vmem>>, vector<8x128xf32>,
    return
  }
  func.func @transform_0(%arg0: i32) -> (i32, i32) {
    %c0_i32 = arith.constant 0 : i32
    %c0_i32_0 = arith.constant 0 : i32
    return %arg0, %c0_i32 : i32, i32
  }
  func.func @transform_1(%arg0: i32) -> (i32, i32) {
    %c0_i32 = arith.constant 0 : i32
    %c0_i32_0 = arith.constant 0 : i32
    %c0_i32_1 = arith.constant 0 : i32
    return %c0_i32, %c0_i32_0 : i32, i32
  }
  func.func @transform_2(%arg0: i32) -> (i32, i32) {
    %c0_i32 = arith.constant 0 : i32
    %c0_i32_0 = arith.constant 0 : i32
    %c0_i32_1 = arith.constant 0 : i32
    return %c0_i32, %c0_i32_0 : i32, i32
  }
  func.func @transform_3(%arg0: i32) -> (i32, i32) {
    %c0_i32 = arith.constant 0 : i32
    %c0_i32_0 = arith.constant 0 : i32
    %c0_i32_1 = arith.constant 0 : i32
    return %c0_i32, %c0_i32_0 : i32, i32
  }
  func.func @transform_4(%arg0: i32) -> (i32, i32) {
    %c0_i32 = arith.constant 0 : i32
    %c0_i32_0 = arith.constant 0 : i32
    %c0_i32_1 = arith.constant 0 : i32
    return %c0_i32, %c0_i32_0 : i32, i32
  }
  func.func @transform_5(%arg0: i32) -> (i32, i32) {
    %c0_i32 = arith.constant 0 : i32
    %c0_i32_0 = arith.constant 0 : i32
    %c0_i32_1 = arith.constant 0 : i32
    return %c0_i32, %c0_i32_0 : i32, i32
  }
  func.func @transform_6(%arg0: i32) -> (i32, i32) {
    %c0_i32 = arith.constant 0 : i32
    %c0_i32_0 = arith.constant 0 : i32
    %c0_i32_1 = arith.constant 0 : i32
    return %c0_i32, %c0_i32_0 : i32, i32
  }
  func.func @transform_7(%arg0: i32) -> (i32, i32) {
    %c0_i32 = arith.constant 0 : i32
    %c0_i32_0 = arith.constant 0 : i32
    %c0_i32_1 = arith.constant 0 : i32
    return %c0_i32, %c0_i32_0 : i32, i32
  }
  func.func @transform_8(%arg0: i32) -> (i32, i32) {
    %c0_i32 = arith.constant 0 : i32
    %c0_i32_0 = arith.constant 0 : i32
    %c0_i32_1 = arith.constant 0 : i32
    return %c0_i32, %c0_i32_0 : i32, i32
  }
  func.func @transform_9(%arg0: i32) -> (i32, i32) {
    %c0_i32 = arith.constant 0 : i32
    %c0_i32_0 = arith.constant 0 : i32
    %c0_i32_1 = arith.constant 0 : i32
    return %c0_i32, %c0_i32_0 : i32, i32
  }
  func.func @transform_10(%arg0: i32) -> (i32, i32) {
    %c0_i32 = arith.constant 0 : i32
    %c0_i32_0 = arith.constant 0 : i32
    %c0_i32_1 = arith.constant 0 : i32
    return %c0_i32, %c0_i32_0 : i32, i32
  }
  func.func @transform_11(%arg0: i32) -> (i32, i32) {
    %c0_i32 = arith.constant 0 : i32
    %c0_i32_0 = arith.constant 0 : i32
    %c0_i32_1 = arith.constant 0 : i32
    return %c0_i32, %c0_i32_0 : i32, i32
  }
  func.func @transform_12(%arg0: i32) -> (i32, i32) {
    %c0_i32 = arith.constant 0 : i32
    %c0_i32_0 = arith.constant 0 : i32
    %c0_i32_1 = arith.constant 0 : i32
    return %c0_i32, %c0_i32_0 : i32, i32
  }
  func.func @transform_13(%arg0: i32) -> (i32, i32) {
    %c0_i32 = arith.constant 0 : i32
    %c0_i32_0 = arith.constant 0 : i32
    %c0_i32_1 = arith.constant 0 : i32
    return %c0_i32, %c0_i32_0 : i32, i32
  }
  func.func @transform_14(%arg0: i32) -> (i32, i32) {
    %c0_i32 = arith.constant 0 : i32
    %c0_i32_0 = arith.constant 0 : i32
    %c0_i32_1 = arith.constant 0 : i32
    return %c0_i32, %c0_i32_0 : i32, i32
  }
  func.func @transform_15(%arg0: i32) -> (i32, i32) {
    %c0_i32 = arith.constant 0 : i32
    %c0_i32_0 = arith.constant 0 : i32
    %c0_i32_1 = arith.constant 0 : i32
    return %c0_i32, %c0_i32_0 : i32, i32
  }
  func.func @transform_16(%arg0: i32) -> (i32, i32) {
    %c0_i32 = arith.constant 0 : i32
    %c0_i32_0 = arith.constant 0 : i32
    %c0_i32_1 = arith.constant 0 : i32
    return %c0_i32, %c0_i32_0 : i32, i32
  }
  func.func @transform_17(%arg0: i32) -> (i32, i32) {
    %c0_i32 = arith.constant 0 : i32
    %c0_i32_0 = arith.constant 0 : i32
    return %arg0, %c0_i32 : i32, i32
  }
}

</mosaic_0001>

<bundles_post_ra>
// kernel: triple_flow_forward.1
= control target key start
LH: loop header
LB: loop body
LE: loop exit
PB: predicated region body
PF: predicated region fallthrough
CT: control target
= control target key end

     0   :  { %v1413_v1 = vmov 0.0|0.0   ;;  %s1414_s18 = smov 96   ;;  %vm1415_vm0 = vmmov 0   ;;  %v1416_v8 = vmov 0.0   ;;  %vm64_vm1 = vcmask 261120   ;;  %s1887_s0 = inlined_call_operand.vmem [shape: f32[8,128], index: 0, kind: input, shape index: {}]   ;;  %s1888_s2 = inlined_call_operand.vmem [shape: f32[32,32], index: 2, kind: input, shape index: {}]   ;;  %s1889_s1 = inlined_call_operand.vmem [shape: f32[32,32], index: 1, kind: input, shape index: {}]   ;;  %s1890_s9 = inlined_call_operand.vmem [shape: f32[32,128], index: 9, kind: input, shape index: {}]   ;;  %s1891_s11 = inlined_call_operand.vmem [shape: f32[32,128], index: 11, kind: input, shape index: {}]   ;;  %s1892_s10 = inlined_call_operand.vmem [shape: f32[32,128], index: 10, kind: input, shape index: {}]   ;;  %s1893_s3 = inlined_call_operand.vmem [shape: f32[1,32], index: 3, kind: input, shape index: {}]   ;;  %s1894_s6 = inlined_call_operand.vmem [shape: f32[32,128], index: 6, kind: input, shape index: {}]   ;;  %s1895_s4 = inlined_call_operand.vmem [shape: f32[1,32], index: 4, kind: input, shape index: {}]   ;;  %s1896_s5 = inlined_call_operand.vmem [shape: f32[1,32], index: 5, kind: input, shape index: {}]   ;;  %s1897_s7 = inlined_call_operand.vmem [shape: f32[32,128], index: 7, kind: input, shape index: {}]   ;;  %s1898_s12 = inlined_call_operand.vmem [shape: f32[128,256], index: 12, kind: input, shape index: {}]   ;;  %s1899_s8 = inlined_call_operand.vmem [shape: f32[1,128], index: 8, kind: input, shape index: {}]   ;;  %s1900_s17 = inlined_call_operand.vmem [shape: f32[8,384], index: 17, kind: output, shape index: {}]   ;;  %s1901_s15 = inlined_call_operand.vmem [shape: f32[256,128], index: 15, kind: input, shape index: {}]   ;;  %s1902_s13 = inlined_call_operand.vmem [shape: f32[1,256], index: 13, kind: input, shape index: {}]   ;;  %s1903_s14 = inlined_call_operand.vmem [shape: f32[1,256], index: 14, kind: input, shape index: {}]   ;;  %s1904_s16 = inlined_call_operand.vmem [shape: f32[1,128], index: 16, kind: input, shape index: {}]  }
   0x1   :  { %1906 = sst [smem:[#allocation2_spill]] %s1887_s0  ;;  %1271 = vmatprep.subr.bf16.mxu1 %v1413_v1  ;;  %1283 = vmatprep.subr.bf16.mxu0 %v1413_v1  ;;  %v137_v7 = vld [vmem:[%s1889_s1] sm:$0xff]  ;;  %v138_v9 = vld [vmem:[%s1889_s1 + $0x8] sm:$0xff]  ;;  %v139_v10 = vld [vmem:[%s1889_s1 + $0x10] sm:$0xff]  ;;  %v1418_v52 = vmov 96  }
   0x2   :  { %1907 = sst [smem:[#allocation3_spill]] %s1888_s2  ;;  %s1908_s26 = sld [smem:[#allocation2_spill]]  ;;  %1191 = vmatprep.mubr.msk.f32.mxu1 %vm1415_vm0, %v1416_v8  ;;  %v140_v11 = vld [vmem:[%s1889_s1 + $0x18] sm:$0xff]  ;;  %1213 = vmatprep.mubr.msk.f32.mxu0 %vm1415_vm0, %v1416_v8  ;;  %v1278_v13 = vpack.c.bf16 %v138_v9, %v137_v7  ;;  %v395_v15 = vld [vmem:[%s1890_s9] sm:$0xff]  ;;  %v396_v16 = vld [vmem:[%s1890_s9 + $0x8] sm:$0xff] }
   0x3   :  { %s1909_s29 = sld [smem:[#allocation3_spill]]  ;;  %v1281_v14 = vpack.c.bf16 %v140_v11, %v139_v10  ;;  %v1296_v18 = vpack.c.bf16 %v396_v16, %v395_v15  ;;  %v397_v19 = vld [vmem:[%s1890_s9 + $0x10] sm:$0xff]  ;;  %v398_v20 = vld [vmem:[%s1890_s9 + $0x18] sm:$0xff]  ;;  %v636_v23 = vld [vmem:[%s1891_s11] sm:$0xff]  ;;  %1391 = vset.pattern.permute.xlu1 %v1418_v52  ;;  %1392 = vset.pattern.permute.xlu0 %v1418_v52 }
   0x4   :  { %1285 = vmatpush3.bf16.msra.mxu0 %v1278_v13  ;;  %v1299_v22 = vpack.c.bf16 %v398_v20, %v397_v19  ;;  %v637_v24 = vld [vmem:[%s1891_s11 + $0x8] sm:$0xff]  ;;  %v638_v26 = vld [vmem:[%s1891_s11 + $0x10] sm:$0xff]  ;;  %v639_v27 = vld [vmem:[%s1891_s11 + $0x18] sm:$0xff] }
   0x5   :  { %1286 = vmatprep.subr.bf16.mxu0 %v1413_v1  ;;  %v1308_v25 = vpack.c.bf16 %v637_v24, %v636_v23  ;;  %v1311_v28 = vpack.c.bf16 %v639_v27, %v638_v26  ;;  %v632_v29 = vld [vmem:[%s1892_s10] sm:$0xff]  ;;  %v633_v30 = vld [vmem:[%s1892_s10 + $0x8] sm:$0xff]  ;;  %v634_v32 = vld [vmem:[%s1892_s10 + $0x10] sm:$0xff] }
   0x6   :  { %v1314_v31 = vpack.c.bf16 %v633_v30, %v632_v29  ;;  %v635_v33 = vld [vmem:[%s1892_s10 + $0x18] sm:$0xff]  ;;  %v1097_v43 = vld [vmem:[%s1893_s3] ss:$0 sm:$0xff] }
   0x7   :  { %v1317_v34 = vpack.c.bf16 %v635_v33, %v634_v32  ;;  %v1098_v15 = vld [vmem:[%s1895_s4] ss:$0 sm:$0xff] }
   0x8   :  { %v1512_v0 = vld [vmem:[%s1908_s26] sm:$0xff]  ;;  %1288 = vmatpush3.bf16.msra.mxu0 %v1281_v14 }
   0x9   :  { %v57_v2 = vld [vmem:[%s1909_s29] sm:$0xff]  ;;  %v58_v3 = vld [vmem:[%s1909_s29 + $0x8] sm:$0xff]  ;;  %62 = vrot.lane.b32.xlu0 %v1512_v0, %s1414_s18  ;;  %v59_v5 = vld [vmem:[%s1909_s29 + $0x10] sm:$0xff]  ;;  %1295 = vmatprep.subr.bf16.mxu0 %v1413_v1  ;;  %v780_v63 = vsub.f32 1.0, %v1512_v0 }
   0xa   :  { %v1272_v4 = vpack.c.bf16 %v58_v3, %v57_v2  ;;  %v60_v6 = vld [vmem:[%s1909_s29 + $0x18] sm:$0xff]  ;;  %s1417_s29 = smov 64   ;;  %v399_v2 = vld [vmem:[%s1894_s6] sm:$0xff]  ;;  %v400_v3 = vld [vmem:[%s1894_s6 + $0x8] sm:$0xff] }
   0xb   :  { %v1275_v12 = vpack.c.bf16 %v60_v6, %v59_v5  ;;  %v401_v5 = vld [vmem:[%s1894_s6 + $0x10] sm:$0xff]  ;;  %v402_v6 = vld [vmem:[%s1894_s6 + $0x18] sm:$0xff] }
   0xc   :  { %1273 = vmatpush3.bf16.msra.mxu1 %v1272_v4  ;;  %v1290_v4 = vpack.c.bf16 %v400_v3, %v399_v2  ;;  %v1293_v7 = vpack.c.bf16 %v402_v6, %v401_v5  ;;  %v547_v5 = vld [vmem:[%s1897_s7 + $0x8] sm:$0xff] }
   0xd   :  { %1274 = vmatprep.subr.bf16.mxu1 %v1413_v1  ;;  %278 = vrot.lane.b32.xlu0 %v1512_v0, %s1417_s29 }
  0x10   :  { %1276 = vmatpush3.bf16.msra.mxu1 %v1275_v12 }
  0x11   :  { %1277 = vmatprep.subr.bf16.mxu1 %v1413_v1 }
  0x7b   :  { %v63_v17 = vpop.permute.xlu0 %62 }
  0x7c   :  { %1192 = vmatmul.mubr.msk.f32.vlgmr.msra.gmra.mrb[0].mxu1 %vm64_vm1, %v63_v17 }
  0x7d   :  { %1279 = vmatpush3.bf16.msra.mxu1 %v1278_v13  ;;  %1202 = vmatprep.mubr.msk.f32.mxu1 %vm1415_vm0, %v1416_v8 }
  0x7e   :  { %1280 = vmatprep.subr.bf16.mxu1 %v1413_v1 }
  0x7f   :  { %v279_v21 = vpop.permute.xlu0 %278 }
  0x80   :  { %1214 = vmatmul.mubr.msk.f32.vlgmr.msra.gmra.mrb[0].mxu0 %vm64_vm1, %v279_v21 }
  0x81   :  { %1282 = vmatpush3.bf16.msra.mxu1 %v1281_v14  ;;  %1297 = vmatpush3.bf16.msra.mxu0 %v1296_v18 }
  0x82   :  { %1298 = vmatprep.subr.bf16.mxu0 %v1413_v1  ;;  %1235 = vmatprep.mubr.msk.f32.mxu0 %vm1415_vm0, %v1416_v8 }
  0x83   :  { %1289 = vmatprep.subr.bf16.mxu1 %v1413_v1 }
  0x84   :  { %1203 = vmatmul.mubr.msk.f32.vlgmr.msra.gmra.mrb[2].mxu1 %vm64_vm1, %v1512_v0 }
  0x85   :  { %1300 = vmatpush3.bf16.msra.mxu0 %v1299_v22  ;;  %1224 = vmatprep.mubr.msk.f32.mxu1 %vm1415_vm0, %v1416_v8 }
  0x86   :  { %1307 = vmatprep.subr.bf16.mxu0 %v1413_v1  ;;  %1291 = vmatpush3.bf16.msra.mxu1 %v1290_v4  ;;  %v546_v4 = vld [vmem:[%s1897_s7] sm:$0xff] }
  0x87   :  { %1292 = vmatprep.subr.bf16.mxu1 %v1413_v1 }
  0x88   :  { %1236 = vmatmul.mubr.msk.f32.vlgmr.msra.gmra.mrb[2].mxu0 %vm64_vm1, %v1512_v0 }
  0x89   :  { %1309 = vmatpush3.bf16.msra.mxu0 %v1308_v25  ;;  %1257 = vmatprep.mubr.msk.f32.mxu0 %vm1415_vm0, %v1416_v8 }
  0x8a   :  { %1310 = vmatprep.subr.bf16.mxu0 %v1413_v1  ;;  %1294 = vmatpush3.bf16.msra.mxu1 %v1293_v7 }
  0x8b   :  { %1301 = vmatprep.subr.bf16.mxu1 %v1413_v1 }
  0x8d   :  { %1312 = vmatpush3.bf16.msra.mxu0 %v1311_v28 }
  0x8e   :  { %1313 = vmatprep.subr.bf16.mxu0 %v1413_v1 }
  0x90   :  { %1258 = vmatmul.mubr.msk.f32.vlgmr.msra.gmra.mrb[4].mxu0 %vm64_vm1, %v279_v21 }
  0x91   :  { %1315 = vmatpush3.bf16.msra.mxu0 %v1314_v31  ;;  %1268 = vmatprep.mubr.msk.f32.mxu0 %vm1415_vm0, %v1416_v8 }
  0x92   :  { %1316 = vmatprep.subr.bf16.mxu0 %v1413_v1 }
  0x95   :  { %1318 = vmatpush3.bf16.msra.mxu0 %v1317_v34 }
  0x98   :  { %1269 = vmatmul.mubr.msk.f32.vlgmr.msra.gmra.mrb[4].mxu0 %vm64_vm1, %v63_v17  ;;  %v1099_v17 = vld [vmem:[%s1896_s5] ss:$0 sm:$0xff] }
 0x14f   :  { %v133_v35 = vpop.f32.mrb[0].mxu1 }
 0x150   :  { %v1193_v36 = vpop.f32.mrb[1].mxu1 }
 0x153   :  { %v348_v37 = vpop.f32.mrb[0].mxu0 }
 0x154   :  { %v349_v38 = vadd.f32 %v348_v37, %v133_v35  ;;  %v1215_v39 = vpop.f32.mrb[1].mxu0 }
 0x156   :  { %v352_v47 = vadd.f32 %v1097_v43, %v349_v38 }
 0x157   :  { %v209_v40 = vpop.f32.mrb[2].mxu1 }
 0x158   :  { %v210_v41 = vadd.f32 %v209_v40, %v133_v35  ;;  %v1204_v42 = vpop.f32.mrb[3].mxu1  ;;  %v353_v49 = vsel %vm64_vm1, %v352_v47, 0.0 }
 0x15a   :  { %v220_v44 = vadd.f32 %v1097_v43, %v210_v41 }
 0x15b   :  { %v1614_v45 = vpop.f32.mrb[2].mxu0 }
 0x15c   :  { %v221_v46 = vsel %vm64_vm1, %v220_v44, 0.0  ;;  %v1237_v48 = vpop.f32.mrb[3].mxu0 }
 0x15d   :  { %222 = vadd.xlane.f32.xlu1 %v221_v46 }
 0x161   :  { %354 = vadd.xlane.f32.xlu1 %v353_v49 }
 0x16b   :  { %v1618_v50 = vpop.f32.mrb[4].mxu0 }
 0x16c   :  { %v1270_v51 = vpop.f32.mrb[5].mxu0 }
 0x1ea   :  { %v223_v53 = vpop.xlane.xlu1 %222 }
 0x1eb   :  { %v225_v54 = vmul.f32 0.03125, %v223_v53 }
 0x1ed   :  { %v226_v55 = vsub.f32 %v220_v44, %v225_v54 }
 0x1ee   :  { %v355_v56 = vpop.xlane.xlu1 %354 }
 0x1ef   :  { %v356_v57 = vmul.f32 0.03125, %v355_v56  ;;  %v227_v58 = vmul.f32 %v226_v55, %v226_v55 }
 0x1f1   :  { %v357_v59 = vsub.f32 %v352_v47, %v356_v57  ;;  %v228_v60 = vsel %vm64_vm1, %v227_v58, 0.0 }
 0x1f2   :  { %229 = vadd.xlane.f32.xlu0 %v228_v60 }
 0x1f3   :  { %v358_v61 = vmul.f32 %v357_v59, %v357_v59 }
 0x1f5   :  { %v359_v62 = vsel %vm64_vm1, %v358_v61, 0.0 }
 0x1f6   :  { %360 = vadd.xlane.f32.xlu1 %v359_v62 }
 0x207   :  { %783 = vperm.xlu1 %1391, %v780_v63  }
 0x20b   :  { %788 = vperm.xlu1 %1391, %v1512_v0  }
 0x27f   :  { %v230_v0 = vpop.xlane.xlu0 %229 }
 0x280   :  { %v231_v9 = vmul.f32 0.03125, %v230_v0 }
 0x282   :  { %v232_v10 = vadd.f32 1e-05, %v231_v9 }
 0x283   :  { %v361_v11 = vpop.xlane.xlu1 %360 }
 0x284   :  { %1393 = vrsqrt.f32 %v232_v10  ;;  %v362_v12 = vmul.f32 0.03125, %v361_v11  ;;  %v1302_v10 = vpack.c.bf16 %v547_v5, %v546_v4  ;;  %v824_v4 = vld [vmem:[%s1898_s12 + $0xf0] sm:$0xff] }
 0x286   :  { %v363_v13 = vadd.f32 1e-05, %v362_v12 }
 0x288   :  { %1395 = vrsqrt.f32 %v363_v13  ;;  %v548_v13 = vld [vmem:[%s1897_s7 + $0x10] sm:$0xff] }
 0x28e   :  { %v1394_v14 = vpop.eup %1393 }
 0x28f   :  { %v234_v16 = vmul.f32 %v1394_v14, %v226_v55  ;;  %v549_v14 = vld [vmem:[%s1897_s7 + $0x18] sm:$0xff] }
 0x291   :  { %v242_v18 = vmul.f32 %v1098_v15, %v234_v16  ;;  %v795_v16 = vld [vmem:[%s1898_s12 + $0x8] sm:$0xff] }
 0x292   :  { %v1396_v19 = vpop.eup %1395 }
 0x293   :  { %v250_v20 = vadd.f32 %v1099_v17, %v242_v18  ;;  %v365_v21 = vmul.f32 %v1396_v19, %v357_v59  ;;  %v1305_v18 = vpack.c.bf16 %v549_v14, %v548_v13 }
 0x295   :  { %v252_v22 = vmul.f32 0.70710677, %v250_v20  ;;  %v366_v23 = vmul.f32 %v1098_v15, %v365_v21  ;;  %v251_v0 = vmul.f32 0.5, %v250_v20  ;;  %v794_v21 = vld [vmem:[%s1898_s12] sm:$0xff] }
 0x297   :  { %v253_v24 = vand.u32 2147483647, %v252_v22  ;;  %v1644_v25 = vadd.f32 %v1099_v17, %v366_v23  ;;  %vm273_vm2 = vcmp.ge.f32.partialorder %v252_v22, 0.0  ;;  %v797_v17 = vld [vmem:[%s1898_s12 + $0x18] sm:$0xff]  ;;  %v796_v22 = vld [vmem:[%s1898_s12 + $0x10] sm:$0xff]  ;;  %v799_v23 = vld [vmem:[%s1898_s12 + $0x28] sm:$0xff] }
 0x298   :  { %v1319_v20 = vpack.c.bf16 %v797_v17, %v795_v16 }
 0x299   :  { %v254_v26 = vmul.f32 0.3275911, %v253_v24  ;;  %v369_v27 = vmul.f32 0.70710677, %v1644_v25  ;;  %v267_v32 = vmul.f32 %v253_v24, %v253_v24  ;;  %v801_v24 = vld [vmem:[%s1898_s12 + $0x38] sm:$0xff] }
 0x29b   :  { %v255_v28 = vadd.f32 1.0, %v254_v26  ;;  %v370_v29 = vand.u32 2147483647, %v369_v27  ;;  %v268_v34 = vsub.f32 0.0, %v267_v32  ;;  %vm390_vm3 = vcmp.ge.f32.partialorder %v369_v27, 0.0 }
 0x29c   :  { %v1321_v26 = vpack.c.bf16 %v796_v22, %v794_v21  ;;  %v980_v22 = vld [vmem:[%s1901_s15 + $0x8] sm:$0xff] }
 0x29d   :  { %1397 = vrcp.f32 %v255_v28  ;;  %v371_v30 = vmul.f32 0.3275911, %v370_v29  ;;  %v384_v35 = vmul.f32 %v370_v29, %v370_v29  ;;  %v269_v39 = vmul.f32 1.442695, %v268_v34  ;;  %v798_v29 = vld [vmem:[%s1898_s12 + $0x20] sm:$0xff] }
 0x29e   :  { %v1323_v28 = vpack.c.bf16 %v801_v24, %v799_v23  ;;  %v802_v34 = vld [vmem:[%s1898_s12 + $0x40] sm:$0xff]  ;;  %v997_v24 = vld [vmem:[%s1901_s15 + $0x90] sm:$0xff] }
 0x29f   :  { %v372_v31 = vadd.f32 1.0, %v371_v30  ;;  %v385_v40 = vsub.f32 0.0, %v384_v35  ;;  %v800_v30 = vld [vmem:[%s1898_s12 + $0x30] sm:$0xff] }
 0x2a0   :  { %v1325_v32 = vpack.c.bf16 %v800_v30, %v798_v29  ;;  %v804_v35 = vld [vmem:[%s1898_s12 + $0x50] sm:$0xff]  ;;  %v999_v30 = vld [vmem:[%s1901_s15 + $0xa0] sm:$0xff] }
 0x2a1   :  { %1399 = vrcp.f32 %v372_v31  ;;  %v386_v46 = vmul.f32 1.442695, %v385_v40  ;;  %v803_v31 = vld [vmem:[%s1898_s12 + $0x48] sm:$0xff]  ;;  %v808_v40 = vld [vmem:[%s1898_s12 + $0x70] sm:$0xff] }
 0x2a2   :  { %1401 = vpow2.f32 %v269_v39  ;;  %v806_v39 = vld [vmem:[%s1898_s12 + $0x60] sm:$0xff] }
 0x2a3   :  { %1403 = vpow2.f32 %v386_v46  ;;  %v810_v46 = vld [vmem:[%s1898_s12 + $0x80] sm:$0xff] }
 0x2a7   :  { %v1398_v33 = vpop.eup %1397 }
 0x2a8   :  { %v258_v36 = vmul.f32 1.0614054, %v1398_v33 }
 0x2aa   :  { %v259_v37 = vadd.f32 -1.4531521, %v258_v36  ;;  %v807_v36 = vld [vmem:[%s1898_s12 + $0x68] sm:$0xff] }
 0x2ab   :  { %v1400_v38 = vpop.eup %1399 }
 0x2ac   :  { %v260_v41 = vmul.f32 %v1398_v33, %v259_v37  ;;  %v375_v42 = vmul.f32 1.0614054, %v1400_v38  ;;  %v1402_v58 = vpop.eup %1401  ;;  %v809_v37 = vld [vmem:[%s1898_s12 + $0x78] sm:$0xff] }
 0x2ad   :  { %v1404_v63 = vpop.eup %1403 }
 0x2ae   :  { %v261_v43 = vadd.f32 1.4214138, %v260_v41  ;;  %v376_v44 = vadd.f32 -1.4531521, %v375_v42  ;;  %v1333_v41 = vpack.c.bf16 %v808_v40, %v806_v39  ;;  %v811_v42 = vld [vmem:[%s1898_s12 + $0x88] sm:$0xff]  ;;  %v1003_v40 = vld [vmem:[%s1901_s15 + $0xc0] sm:$0xff] }
 0x2b0   :  { %v262_v47 = vmul.f32 %v1398_v33, %v261_v43  ;;  %v377_v48 = vmul.f32 %v1400_v38, %v376_v44  ;;  %v813_v43 = vld [vmem:[%s1898_s12 + $0x98] sm:$0xff] }
 0x2b1   :  { %v1335_v44 = vpack.c.bf16 %v813_v43, %v811_v42  ;;  %v987_v43 = vld [vmem:[%s1901_s15 + $0x40] sm:$0xff] }
 0x2b2   :  { %v263_v49 = vadd.f32 -0.28449672, %v262_v47  ;;  %v378_v51 = vadd.f32 1.4214138, %v377_v48  ;;  %v812_v47 = vld [vmem:[%s1898_s12 + $0x90] sm:$0xff] }
 0x2b3   :  { %v1337_v48 = vpack.c.bf16 %v812_v47, %v810_v46  ;;  %v1005_v47 = vld [vmem:[%s1901_s15 + $0xd0] sm:$0xff] }
 0x2b4   :  { %v264_v52 = vmul.f32 %v1398_v33, %v263_v49  ;;  %v379_v53 = vmul.f32 %v1400_v38, %v378_v51  ;;  %v815_v49 = vld [vmem:[%s1898_s12 + $0xa8] sm:$0xff]  ;;  %v817_v51 = vld [vmem:[%s1898_s12 + $0xb8] sm:$0xff] }
 0x2b6   :  { %v265_v54 = vadd.f32 0.2548296, %v264_v52  ;;  %v380_v55 = vadd.f32 -0.28449672, %v379_v53  ;;  %v814_v52 = vld [vmem:[%s1898_s12 + $0xa0] sm:$0xff]  ;;  %v1339_v53 = vpack.c.bf16 %v817_v51, %v815_v49  ;;  %v989_v51 = vld [vmem:[%s1901_s15 + $0x50] sm:$0xff] }
 0x2b8   :  { %v266_v56 = vmul.f32 %v1398_v33, %v265_v54  ;;  %v381_v57 = vmul.f32 %v1400_v38, %v380_v55  ;;  %v816_v54 = vld [vmem:[%s1898_s12 + $0xb0] sm:$0xff] }
 0x2b9   :  { %v1341_v55 = vpack.c.bf16 %v816_v54, %v814_v52  ;;  %v990_v52 = vld [vmem:[%s1901_s15 + $0x58] sm:$0xff]  ;;  %v1007_v54 = vld [vmem:[%s1901_s15 + $0xe0] sm:$0xff] }
 0x2ba   :  { %v271_v59 = vmul.f32 %v1402_v58, %v266_v56  ;;  %v382_v60 = vadd.f32 0.2548296, %v381_v57  ;;  %v819_v56 = vld [vmem:[%s1898_s12 + $0xc8] sm:$0xff]  ;;  %v821_v57 = vld [vmem:[%s1898_s12 + $0xd8] sm:$0xff] }
 0x2bb   :  { %v1343_v58 = vpack.c.bf16 %v821_v57, %v819_v56  ;;  %v991_v57 = vld [vmem:[%s1901_s15 + $0x60] sm:$0xff] }
 0x2bc   :  { %v272_v61 = vsub.f32 1.0, %v271_v59  ;;  %v383_v62 = vmul.f32 %v1400_v38, %v382_v60  ;;  %v1331_v38 = vpack.c.bf16 %v809_v37, %v807_v36  ;;  %v818_v59 = vld [vmem:[%s1898_s12 + $0xc0] sm:$0xff]  ;;  %v820_v60 = vld [vmem:[%s1898_s12 + $0xd0] sm:$0xff]  ;;  %v1002_v36 = vld [vmem:[%s1901_s15 + $0xb8] sm:$0xff] }
 0x2be   :  { %v274_v2 = vsub.f32 0.0, %v272_v61  ;;  %v388_v3 = vmul.f32 %v1404_v63, %v383_v62  ;;  %v823_v62 = vld [vmem:[%s1898_s12 + $0xe8] sm:$0xff]  ;;  %v825_v63 = vld [vmem:[%s1898_s12 + $0xf8] sm:$0xff] }
 0x2c0   :  { %v275_v6 = vsel %vm273_vm2, %v272_v61, %v274_v2  ;;  %v389_v7 = vsub.f32 1.0, %v388_v3  ;;  %v1345_v61 = vpack.c.bf16 %v820_v60, %v818_v59  ;;  %v1347_v2 = vpack.c.bf16 %v825_v63, %v823_v62  ;;  %v822_v3 = vld [vmem:[%s1898_s12 + $0xe0] sm:$0xff]  ;;  %v1009_v60 = vld [vmem:[%s1901_s15 + $0xf0] sm:$0xff] }
 0x2c1   :  { %v276_v9 = vadd.f32 1.0, %v275_v6  ;;  %v1349_v5 = vpack.c.bf16 %v824_v4, %v822_v3  ;;  %v993_v63 = vld [vmem:[%s1901_s15 + $0x70] sm:$0xff]  ;;  %v828_v4 = vlaneseq }
 0x2c2   :  { %v391_v11 = vsub.f32 0.0, %v389_v7 }
 0x2c3   :  { %v277_v12 = vmul.f32 %v276_v9, %v251_v0  ;;  %v784_v9 = vpop.permute.xlu1 %783 }
 0x2c4   :  { %v392_v15 = vsel %vm390_vm3, %v389_v7, %v391_v11  ;;  %v1104_v11 = vld [vmem:[%s1899_s8] ss:$0 sm:$0xff] }
 0x2c5   :  { %1225 = vmatmul.mubr.msk.f32.vlgmr.msra.gmra.mrb[4].mxu1 %vm64_vm1, %v277_v12  ;;  %v393_v19 = vadd.f32 1.0, %v392_v15 }
 0x2c6   :  { %1303 = vmatpush3.bf16.msra.mxu1 %v1302_v10  ;;  %1246 = vmatprep.mubr.msk.f32.mxu1 %vm1415_vm0, %v1416_v8 }
 0x2c7   :  { %1304 = vmatprep.subr.bf16.mxu1 %v1413_v1  ;;  %v368_v1 = vmul.f32 0.5, %v1644_v25  ;;  %v805_v25 = vld [vmem:[%s1898_s12 + $0x58] sm:$0xff]  ;;  %v1766_v14 = vpop.permute.xlu1 %788 }
 0x2c8   :  { %v1327_v33 = vpack.c.bf16 %v805_v25, %v803_v31  ;;  %v791_v16 = vmul.f32 %v1766_v14, %v1618_v50  ;;  %v1000_v31 = vld [vmem:[%s1901_s15 + $0xa8] sm:$0xff] }
 0x2c9   :  { %v394_v27 = vmul.f32 %v393_v19, %v368_v1  ;;  %v998_v1 = vld [vmem:[%s1901_s15 + $0x98] sm:$0xff]  ;;  %v1359_v25 = vpack.c.bf16 %v1000_v31, %v999_v30 }
 0x2ca   :  { %1306 = vmatpush3.bf16.msra.mxu1 %v1305_v18 }
 0x2cb   :  { %1320 = vmatprep.subr.bf16.mxu1 %v1319_v20  ;;  %v996_v20 = vld [vmem:[%s1901_s15 + $0x88] sm:$0xff] }
 0x2cd   :  { %1247 = vmatmul.mubr.msk.f32.vlgmr.msra.gmra.mrb[6].mxu1 %vm64_vm1, %v394_v27  ;;  %v981_v27 = vld [vmem:[%s1901_s15 + $0x10] sm:$0xff] }
 0x2ce   :  { %1322 = vmatpush1.bf16.msra.mxu1 %v1321_v26  ;;  %904 = vmatprep.mubr.f32.mxu1 %v1416_v8  ;;  %v1329_v8 = vpack.c.bf16 %v804_v35, %v802_v34  ;;  %v1355_v26 = vpack.c.bf16 %v998_v1, %v997_v24  ;;  %v1001_v35 = vld [vmem:[%s1901_s15 + $0xb0] sm:$0xff] }
 0x2cf   :  { %1324 = vmatprep.subr.bf16.mxu1 %v1323_v28  ;;  %v982_v28 = vld [vmem:[%s1901_s15 + $0x18] sm:$0xff]  ;;  %v1363_v37 = vpack.c.bf16 %v1002_v36, %v1001_v35 }
 0x2d0   :  { %v1357_v29 = vpack.c.bf16 %v982_v28, %v981_v27 }
 0x2d2   :  { %1326 = vmatpush1.bf16.msra.mxu1 %v1325_v32  ;;  %v983_v32 = vld [vmem:[%s1901_s15 + $0x20] sm:$0xff] }
 0x2d3   :  { %1328 = vmatprep.subr.bf16.mxu1 %v1327_v33  ;;  %v984_v33 = vld [vmem:[%s1901_s15 + $0x28] sm:$0xff] }
 0x2d4   :  { %v1361_v34 = vpack.c.bf16 %v984_v33, %v983_v32 }
 0x2d6   :  { %1330 = vmatpush1.bf16.msra.mxu1 %v1329_v8  ;;  %v985_v8 = vld [vmem:[%s1901_s15 + $0x30] sm:$0xff] }
 0x2d7   :  { %1332 = vmatprep.subr.bf16.mxu1 %v1331_v38  ;;  %v986_v38 = vld [vmem:[%s1901_s15 + $0x38] sm:$0xff] }
 0x2d8   :  { %v1365_v39 = vpack.c.bf16 %v986_v38, %v985_v8 }
 0x2da   :  { %1334 = vmatpush1.bf16.msra.mxu1 %v1333_v41  ;;  %v1004_v41 = vld [vmem:[%s1901_s15 + $0xc8] sm:$0xff] }
 0x2db   :  { %1336 = vmatprep.subr.bf16.mxu1 %v1335_v44  ;;  %v1367_v42 = vpack.c.bf16 %v1004_v41, %v1003_v40  ;;  %v988_v44 = vld [vmem:[%s1901_s15 + $0x48] sm:$0xff] }
 0x2dc   :  { %v1369_v46 = vpack.c.bf16 %v988_v44, %v987_v43 }
 0x2de   :  { %1338 = vmatpush1.bf16.msra.mxu1 %v1337_v48  ;;  %v1006_v48 = vld [vmem:[%s1901_s15 + $0xd8] sm:$0xff] }
 0x2df   :  { %1340 = vmatprep.subr.bf16.mxu1 %v1339_v53  ;;  %v1371_v49 = vpack.c.bf16 %v1006_v48, %v1005_v47  ;;  %v1373_v53 = vpack.c.bf16 %v990_v52, %v989_v51 }
 0x2e2   :  { %1342 = vmatpush1.bf16.msra.mxu1 %v1341_v55  ;;  %v1008_v55 = vld [vmem:[%s1901_s15 + $0xe8] sm:$0xff] }
 0x2e3   :  { %1344 = vmatprep.subr.bf16.mxu1 %v1343_v58  ;;  %v1375_v56 = vpack.c.bf16 %v1008_v55, %v1007_v54  ;;  %v992_v58 = vld [vmem:[%s1901_s15 + $0x68] sm:$0xff] }
 0x2e4   :  { %v1377_v59 = vpack.c.bf16 %v992_v58, %v991_v57 }
 0x2e6   :  { %1346 = vmatpush1.bf16.msra.mxu1 %v1345_v61  ;;  %v1010_v61 = vld [vmem:[%s1901_s15 + $0xf8] sm:$0xff] }
 0x2e7   :  { %1348 = vmatprep.subr.bf16.mxu1 %v1347_v2  ;;  %v1379_v62 = vpack.c.bf16 %v1010_v61, %v1009_v60  ;;  %v994_v2 = vld [vmem:[%s1901_s15 + $0x78] sm:$0xff] }
 0x2e8   :  { %v1381_v3 = vpack.c.bf16 %v994_v2, %v993_v63 }
 0x2ea   :  { %1350 = vmatpush1.bf16.msra.mxu1 %v1349_v5  ;;  %v829_v5 = vshrl.u32 %v828_v4, 7 }
 0x398   :  { %v472_v6 = vpop.f32.mrb[4].mxu1 }
 0x399   :  { %v543_v7 = vadd.f32 %v1614_v45, %v472_v6  ;;  %v1226_v0 = vpop.f32.mrb[5].mxu1  ;;  %v995_v45 = vld [vmem:[%s1901_s15 + $0x80] sm:$0xff]  ;;  %v830_v6 = vsub.s32 0, %v829_v5 }
 0x39a   :  { %v1351_v21 = vpack.c.bf16 %v996_v20, %v995_v45  ;;  %v834_v0 = vsub.s32 1, %v829_v5 }
 0x39c   :  { %1352 = vmatprep.subr.bf16.mxu0 %v1351_v21 }
 0x3a0   :  { %v619_v10 = vpop.f32.mrb[6].mxu1 }
 0x3a1   :  { %v623_v12 = vadd.f32 %v619_v10, %v543_v7  ;;  %v1248_v13 = vpop.f32.mrb[7].mxu1  ;;  %v826_v7 = vld [vmem:[%s1902_s13] sm:$0x3] }
 0x3a2   :  { %v835_v10 = vrot.slane %v826_v7, %v834_v0 }
 0x3a3   :  { %v631_v15 = vadd.f32 %v1104_v11, %v623_v12  ;;  %v911_v11 = vld [vmem:[%s1903_s14] sm:$0x3] }
 0x3a4   :  { %v916_v13 = vrot.slane %v911_v11, %v830_v6 }
 0x3a5   :  { %v786_v17 = vmul.f32 %v784_v9, %v631_v15  ;;  %v793_v18 = vsub.f32 %v1618_v50, %v631_v15  ;;  %v979_v50 = vld [vmem:[%s1901_s15] sm:$0xff]  ;;  %v831_v9 = vrot.slane %v826_v7, %v830_v6  ;;  %v839_v15 = vmul.f32 %v835_v10, %v1766_v14 }
 0x3a6   :  { %v1353_v23 = vpack.c.bf16 %v980_v22, %v979_v50 }
 0x3a7   :  { %v792_v19 = vadd.f32 %v791_v16, %v786_v17  ;;  %1089 = vst [vmem:[%s1900_s17 + $0x8] sm:$0xff] %v793_v18  ;;  %v838_v12 = vmul.f32 %v831_v9, %v1766_v14  ;;  %v920_v17 = vrot.slane %v911_v11, %v834_v0  ;;  %v1107_v9 = vld [vmem:[%s1904_s16] ss:$0 sm:$0xff] }
 0x3a8   :  { %1354 = vmatpush3.bf16.msra.mxu0 %v1353_v23 }
 0x3a9   :  { %1088 = vst [vmem:[%s1900_s17] sm:$0xff] %v792_v19  ;;  %905 = vmatmul.mubr.f32.vlgmr.msra.gmra.mrb[8].mxu1 %v792_v19  ;;  %1356 = vmatprep.subr.bf16.mxu0 %v1355_v26 }
 0x3ac   :  { %1358 = vmatpush3.bf16.msra.mxu0 %v1357_v29 }
 0x3ad   :  { %1360 = vmatprep.subr.bf16.mxu0 %v1359_v25 }
 0x3b0   :  { %1362 = vmatpush3.bf16.msra.mxu0 %v1361_v34 }
 0x3b1   :  { %1364 = vmatprep.subr.bf16.mxu0 %v1363_v37 }
 0x3b4   :  { %1366 = vmatpush3.bf16.msra.mxu0 %v1365_v39 }
 0x3b5   :  { %1368 = vmatprep.subr.bf16.mxu0 %v1367_v42 }
 0x3b8   :  { %1370 = vmatpush3.bf16.msra.mxu0 %v1369_v46 }
 0x3b9   :  { %1372 = vmatprep.subr.bf16.mxu0 %v1371_v49 }
 0x3bc   :  { %1374 = vmatpush3.bf16.msra.mxu0 %v1373_v53 }
 0x3bd   :  { %1376 = vmatprep.subr.bf16.mxu0 %v1375_v56 }
 0x3c0   :  { %1378 = vmatpush3.bf16.msra.mxu0 %v1377_v59 }
 0x3c1   :  { %1380 = vmatprep.subr.bf16.mxu0 %v1379_v62 }
 0x3c4   :  { %1382 = vmatpush3.bf16.msra.mxu0 %v1381_v3 }
 0x47c   :  { %v906_v16 = vpop.f32.mrb[8].mxu1 }
 0x47d   :  { %v907_v18 = vadd.f32 %v906_v16, %v838_v12  ;;  %v908_v19 = vpop.f32.mrb[9].mxu1 }
 0x47e   :  { %v909_v45 = vadd.f32 %v908_v19, %v839_v15 }
 0x47f   :  { %v923_v20 = vadd.f32 %v916_v13, %v907_v18 }
 0x480   :  { %v924_v21 = vadd.f32 %v920_v17, %v909_v45 }
 0x481   :  { %v927_v50 = vmul.f32 0.70710677, %v923_v20  ;;  %v925_v5 = vmul.f32 0.5, %v923_v20 }
 0x482   :  { %v928_v22 = vmul.f32 0.70710677, %v924_v21  ;;  %v926_v3 = vmul.f32 0.5, %v924_v21 }
 0x483   :  { %v929_v23 = vand.u32 2147483647, %v927_v50  ;;  %vm969_vm4 = vcmp.ge.f32.partialorder %v927_v50, 0.0 }
 0x484   :  { %v930_v24 = vand.u32 2147483647, %v928_v22  ;;  %vm970_vm5 = vcmp.ge.f32.partialorder %v928_v22, 0.0 }
 0x485   :  { %v931_v1 = vmul.f32 0.3275911, %v929_v23  ;;  %v957_v29 = vmul.f32 %v929_v23, %v929_v23 }
 0x486   :  { %v932_v26 = vmul.f32 0.3275911, %v930_v24  ;;  %v958_v30 = vmul.f32 %v930_v24, %v930_v24 }
 0x487   :  { %v933_v27 = vadd.f32 1.0, %v931_v1  ;;  %v959_v31 = vsub.f32 0.0, %v957_v29 }
 0x488   :  { %v934_v28 = vadd.f32 1.0, %v932_v26  ;;  %v960_v33 = vsub.f32 0.0, %v958_v30 }
 0x489   :  { %1405 = vrcp.f32 %v933_v27  ;;  %v961_v36 = vmul.f32 1.442695, %v959_v31 }
 0x48a   :  { %1407 = vrcp.f32 %v934_v28  ;;  %v963_v38 = vmul.f32 1.442695, %v960_v33 }
 0x48b   :  { %1409 = vpow2.f32 %v961_v36 }
 0x48c   :  { %1411 = vpow2.f32 %v963_v38 }
 0x493   :  { %v1406_v14 = vpop.eup %1405 }
 0x494   :  { %v1408_v25 = vpop.eup %1407  ;;  %v939_v32 = vmul.f32 1.0614054, %v1406_v14 }
 0x495   :  { %v940_v34 = vmul.f32 1.0614054, %v1408_v25  ;;  %v1410_v53 = vpop.eup %1409 }
 0x496   :  { %v941_v35 = vadd.f32 -1.4531521, %v939_v32  ;;  %v1412_v55 = vpop.eup %1411 }
 0x497   :  { %v942_v37 = vadd.f32 -1.4531521, %v940_v34 }
 0x498   :  { %v943_v8 = vmul.f32 %v1406_v14, %v941_v35 }
 0x499   :  { %v944_v39 = vmul.f32 %v1408_v25, %v942_v37 }
 0x49a   :  { %v945_v40 = vadd.f32 1.4214138, %v943_v8 }
 0x49b   :  { %v946_v41 = vadd.f32 1.4214138, %v944_v39 }
 0x49c   :  { %v947_v42 = vmul.f32 %v1406_v14, %v945_v40 }
 0x49d   :  { %v948_v43 = vmul.f32 %v1408_v25, %v946_v41 }
 0x49e   :  { %v949_v44 = vadd.f32 -0.28449672, %v947_v42 }
 0x49f   :  { %v950_v46 = vadd.f32 -0.28449672, %v948_v43 }
 0x4a0   :  { %v951_v47 = vmul.f32 %v1406_v14, %v949_v44 }
 0x4a1   :  { %v952_v48 = vmul.f32 %v1408_v25, %v950_v46 }
 0x4a2   :  { %v953_v49 = vadd.f32 0.2548296, %v951_v47 }
 0x4a3   :  { %v954_v51 = vadd.f32 0.2548296, %v952_v48 }
 0x4a4   :  { %v955_v52 = vmul.f32 %v1406_v14, %v953_v49 }
 0x4a5   :  { %v956_v54 = vmul.f32 %v1408_v25, %v954_v51 }
 0x4a6   :  { %v965_v56 = vmul.f32 %v1410_v53, %v955_v52 }
 0x4a7   :  { %v966_v57 = vmul.f32 %v1412_v55, %v956_v54 }
 0x4a8   :  { %v967_v58 = vsub.f32 1.0, %v965_v56 }
 0x4a9   :  { %v968_v59 = vsub.f32 1.0, %v966_v57 }
 0x4aa   :  { %v971_v60 = vsub.f32 0.0, %v967_v58 }
 0x4ab   :  { %v972_v61 = vsub.f32 0.0, %v968_v59 }
 0x4ac   :  { %v973_v62 = vsel %vm969_vm4, %v967_v58, %v971_v60 }
 0x4ad   :  { %v975_v63 = vadd.f32 1.0, %v973_v62  ;;  %v974_v2 = vsel %vm970_vm5, %v968_v59, %v972_v61 }
 0x4ae   :  { %v976_v4 = vadd.f32 1.0, %v974_v2 }
 0x4af   :  { %v977_v7 = vmul.f32 %v975_v63, %v925_v5 }
 0x4b0   :  { %v978_v6 = vmul.f32 %v976_v4, %v926_v3 }
 0x4b2   :  { %1082 = vmatprep.mubr.f32.mxu0 %v978_v6 }
 0x4b3   :  { %1083 = vmatmul.mubr.f32.vlgmr.msra.gmra.mrb[6].mxu0 %v977_v7 }
 0x586   :  { %v1180_v0 = vpop.f32.mrb[6].mxu0 }
 0x587   :  { %v1181_v10 = vpop.f32.mrb[7].mxu0 }
 0x588   :  { %v1182_v11 = vadd.f32 %v1181_v10, %v1180_v0 }
 0x58a   :  { %v1085_v12 = vadd.f32 %v1182_v11, %v1107_v9 }
 0x58c   :  { %1090 = vst [vmem:[%s1900_s17 + $0x10] sm:$0xff] %v1085_v12 }

</bundles_post_ra>
